<compile_context>
chip_gen: v7x
topology: tpu7x:2x2x1
jax: 0.10.0
libtpu: 0.0.40
codegen_flags: <defaults>
</compile_context>

<pallas_src>
import functools

import jax
import jax.numpy as jnp
from jax.experimental import pallas as pl
from jax.experimental.pallas import tpu as pltpu

LANE = 128
F32 = jnp.float32
BF16 = jnp.bfloat16


def _round_up(x, m):
    return ((x + m - 1) // m) * m


def _pad2d(a, rows, cols):
    r, c = a.shape
    return jnp.pad(a, ((0, rows - r), (0, cols - c)))


def _vmem_cap_bytes():
    """Physical VMEM per TensorCore minus headroom for compiler scratch."""
    try:
        phys = int(pltpu.get_tpu_info().vmem_capacity_bytes)
    except Exception:
        phys = 64 * 2**20            # conservative (v7x) if the query fails
    return int(phys * 0.8)           # ~51 MiB on v7x, ~102 MiB on v5e/v6e


# --------------------------------------------------------------------------
# Kernels
# --------------------------------------------------------------------------
def _feature_transform_kernel(x_ref, w1_ref, xw_ref):
    """XW = x @ W1, tiled over node rows only (runs once per row block)."""
    xw_ref[...] = jnp.dot(x_ref[...], w1_ref[...],
                          preferred_element_type=jnp.float32).astype(xw_ref.dtype)


def _layer1_agg_kernel(a_ref, xw_ref, b1_ref, w2_ref, hw_ref, acc_ref):
    """acc = A_hat @ XW over source blocks; finalize emits
    HW = relu(acc + b1) @ W2 (so layer 2 only needs A_hat and HW)."""
    k = pl.program_id(1)

    @pl.when(k == 0)
    def _():
        acc_ref[...] = jnp.zeros_like(acc_ref)

    acc_ref[...] += jnp.dot(a_ref[...], xw_ref[...],
                            preferred_element_type=jnp.float32)

    @pl.when(k == pl.num_programs(1) - 1)
    def _():
        h1 = jnp.maximum(acc_ref[...] + b1_ref[...], 0.0)      # f32 bias + ReLU
        hw_ref[...] = jnp.dot(h1.astype(jnp.bfloat16), w2_ref[...],
                              preferred_element_type=jnp.float32
                              ).astype(hw_ref.dtype)


def _layer2_agg_kernel(a_ref, hw_ref, b2_ref, gv_ref, gb_ref, rw_ref,
                       out_ref, acc_ref, *, out_dim):
    """h2 = A_hat @ HW + b2, then fused gate + enhancement + log_softmax."""
    k = pl.program_id(1)

    @pl.when(k == 0)
    def _():
        acc_ref[...] = jnp.zeros_like(acc_ref)

    acc_ref[...] += jnp.dot(a_ref[...], hw_ref[...],
                            preferred_element_type=jnp.float32)

    @pl.when(k == pl.num_programs(1) - 1)
    def _():
        h2 = acc_ref[...] + b2_ref[...]                        # (tm, out_p) f32
        # Fused enhancement gate: Linear(out->rules) then Linear(rules->1)
        # collapses to one (1, out_p) vector; VPU multiply + cross-lane sum.
        logits = jnp.sum(h2 * gv_ref[...], axis=-1, keepdims=True) + gb_ref[0, 0]
        gate = jax.nn.sigmoid(logits)
        h3 = h2 + gate * rw_ref[0, 0]
        # log_softmax over the real (unpadded) class columns only.
        col = jax.lax.broadcasted_iota(jnp.int32, h3.shape, 1)
        h3 = jnp.where(col < out_dim, h3, -1e30)
        m = jnp.max(h3, axis=-1, keepdims=True)
        s = h3 - m
        lse = jnp.log(jnp.sum(jnp.exp(s), axis=-1, keepdims=True))
        out_ref[...] = s - lse


# --------------------------------------------------------------------------
# Wrapper
# --------------------------------------------------------------------------
def kegnn_forward(a_hat, x, params, *, tile_m=None, tile_k=None):
    """Fused KeGNN (GCN base) forward as three Pallas TPU kernels."""
    N, in_dim = x.shape
    hidden = params["w1"].shape[1]
    out_dim = params["w2"].shape[1]

    # Lane-dense padding of feature axes; node axis padded to the row tile.
    in_p = _round_up(in_dim, LANE)
    hid_p = _round_up(hidden, LANE)
    out_p = _round_up(out_dim, LANE)

    # Row tile: keep padding waste low for small graphs (and >=2 row blocks so
    # v7x megacore actually splits work); bigger tiles for large graphs.
    if tile_m is None:
        tile_m = 128 if N <= 2048 else (256 if N <= 8192 else 512)
    n_pad = _round_up(N, tile_m)
    # Reduction tile: take the whole source axis in one step when it's small
    # (no k-loop / accumulator revisits), otherwise tile it.
    if tile_k is None:
        tile_k = n_pad if n_pad <= 2048 else tile_m
    grid = (n_pad // tile_m, n_pad // tile_k)

    a_p = _pad2d(a_hat, n_pad, n_pad).astype(BF16)
    x_p = _pad2d(x, n_pad, in_p).astype(BF16)
    w1_p = _pad2d(params["w1"], in_p, hid_p).astype(BF16)
    b1_p = _pad2d(params["b1"], 1, hid_p).astype(F32)
    w2_p = _pad2d(params["w2"], hid_p, out_p).astype(BF16)
    b2_p = _pad2d(params["b2"], 1, out_p).astype(F32)

    # Algebraic fusion of the enhancement gate:
    #   gate = sigmoid(h2 @ (W_enh @ w_gate^T) + (b_enh @ w_gate^T + b_gate))
    gate_vec = params["w_enh"] @ params["w_gate"].T                        # (out_dim, 1)
    gate_bias = params["b_enh"] @ params["w_gate"].T + params["b_gate"]    # (1, 1)
    gv = _pad2d(gate_vec.T, 1, out_p).astype(F32)                          # (1, out_p)
    gb = gate_bias.astype(F32).reshape(1, 1)
    rw = params["rule_weight"].astype(F32).reshape(1, 1)

    # VMEM budget: double-buffered streamed blocks + accumulator + constants,
    # 2x slack, clamped under ~80% of this generation's physical VMEM.
    feat = max(hid_p, out_p)
    est = (2 * tile_m * tile_k * 2            # A_hat tiles (bf16, 2-buffered)
           + 2 * tile_k * feat * 2            # streamed XW / HW source tiles
           + 2 * tile_m * out_p * 4           # f32 output tiles
           + 2 * tile_m * out_p * 2           # bf16 HW output tiles
           + tile_m * feat * 4                # accumulator scratch
           + 2 * (hid_p * out_p * 2 + 8 * feat * 4))   # resident weights/biases
    vmem_limit = int(min(max(2 * est, 16 * 2**20), _vmem_cap_bytes()))

    agg_cparams = pltpu.CompilerParams(
        dimension_semantics=("parallel", "arbitrary"),
        vmem_limit_bytes=vmem_limit)
    row_cparams = pltpu.CompilerParams(
        dimension_semantics=("parallel",),
        vmem_limit_bytes=vmem_limit)

    smem = pl.BlockSpec(memory_space=pltpu.MemorySpace.SMEM)

    # --- Feature transform (once per node row block): XW = x @ W1 ---
    xw = pl.pallas_call(
        _feature_transform_kernel,
        out_shape=jax.ShapeDtypeStruct((n_pad, hid_p), BF16),
        grid=(n_pad // tile_m,),
        in_specs=[pl.BlockSpec((tile_m, in_p), lambda i: (i, 0)),
                  pl.BlockSpec((in_p, hid_p), lambda i: (0, 0))],
        out_specs=pl.BlockSpec((tile_m, hid_p), lambda i: (i, 0)),
        compiler_params=row_cparams,
    )(x_p, w1_p)

    # --- Layer 1 aggregation + fused h1 @ W2: HW = relu(A @ XW + b1) @ W2 ---
    hw = pl.pallas_call(
        _layer1_agg_kernel,
        out_shape=jax.ShapeDtypeStruct((n_pad, out_p), BF16),
        grid=grid,
        in_specs=[
            pl.BlockSpec((tile_m, tile_k), lambda i, k: (i, k)),   # A_hat tile
            pl.BlockSpec((tile_k, hid_p), lambda i, k: (k, 0)),    # XW src block
            pl.BlockSpec((1, hid_p), lambda i, k: (0, 0)),         # b1
            pl.BlockSpec((hid_p, out_p), lambda i, k: (0, 0)),     # W2
        ],
        out_specs=pl.BlockSpec((tile_m, out_p), lambda i, k: (i, 0)),
        scratch_shapes=[pltpu.VMEM((tile_m, hid_p), F32)],
        compiler_params=agg_cparams,
    )(a_p, xw, b1_p, w2_p)

    # --- Layer 2 aggregation + knowledge-enhancement gate + log_softmax ---
    out_pad = pl.pallas_call(
        functools.partial(_layer2_agg_kernel, out_dim=out_dim),
        out_shape=jax.ShapeDtypeStruct((n_pad, out_p), F32),
        grid=grid,
        in_specs=[
            pl.BlockSpec((tile_m, tile_k), lambda i, k: (i, k)),   # A_hat tile
            pl.BlockSpec((tile_k, out_p), lambda i, k: (k, 0)),    # HW src block
            pl.BlockSpec((1, out_p), lambda i, k: (0, 0)),         # b2
            pl.BlockSpec((1, out_p), lambda i, k: (0, 0)),         # fused gate vec
            smem,                                                   # fused gate bias
            smem,                                                   # rule weight
        ],
        out_specs=pl.BlockSpec((tile_m, out_p), lambda i, k: (i, 0)),
        scratch_shapes=[pltpu.VMEM((tile_m, out_p), F32)],
        compiler_params=agg_cparams,
    )(a_p, hw, b2_p, gv, gb, rw)

    # Lane-dense padded output; slice the real slab outside the kernel.
    return out_pad[:N, :out_dim]


# --------------------------------------------------------------------------
# Graph / parameter construction and reference
# --------------------------------------------------------------------------
def build_normalized_adjacency(edge_index, num_nodes):
    """Dense equivalent of PyG GCNConv's gcn_norm (self loops + sym norm)."""
    src, dst = edge_index[0], edge_index[1]
    a = jnp.zeros((num_nodes, num_nodes), jnp.float32)
    a = a.at[dst, src].set(1.0)                 # a[dst, src] aggregates src -> dst
    a = jnp.where(jnp.eye(num_nodes, dtype=bool), 1.0, a)   # exact self loops
    deg = jnp.sum(a, axis=1)
    d_inv_sqrt = jnp.where(deg > 0, 1.0 / jnp.sqrt(deg), 0.0)
    return d_inv_sqrt[:, None] * a * d_inv_sqrt[None, :]


def init_params(key, in_dim, hidden_dim, out_dim, num_rules):
    ks = jax.random.split(key, 9)
    u = lambda k, shp, fan_in: jax.random.uniform(
        k, shp, jnp.float32, -1.0 / jnp.sqrt(fan_in), 1.0 / jnp.sqrt(fan_in))
    return {
        "w1": u(ks[0], (in_dim, hidden_dim), in_dim),
        "b1": u(ks[1], (1, hidden_dim), in_dim),
        "w2": u(ks[2], (hidden_dim, out_dim), hidden_dim),
        "b2": u(ks[3], (1, out_dim), hidden_dim),
        "w_enh": u(ks[4], (out_dim, num_rules), out_dim),
        "b_enh": u(ks[5], (1, num_rules), out_dim),
        "w_gate": u(ks[6], (1, num_rules), num_rules),
        "b_gate": u(ks[7], (1, 1), num_rules),
        "rule_weight": jax.random.uniform(ks[8], (1, 1), jnp.float32),  # torch.rand(1)
    }


def reference_forward(a_hat, x, p, *, emulate_bf16=False):
    """Plain-JAX reference; optionally mirrors the kernel's bf16 MXU inputs."""
    cast = (lambda t: t.astype(jnp.bfloat16)) if emulate_bf16 else (lambda t: t)
    dot = lambda a, b: jnp.dot(cast(a), cast(b), preferred_element_type=jnp.float32)
    h1 = jax.nn.relu(dot(a_hat, dot(x, p["w1"])) + p["b1"])
    h2 = dot(a_hat, dot(h1, p["w2"])) + p["b2"]
    rule_out = h2 @ p["w_enh"] + p["b_enh"]
    gate = jax.nn.sigmoid(jnp.sum(rule_out * p["w_gate"], -1, keepdims=True)
                          + p["b_gate"])
    h3 = h2 + gate * p["rule_weight"]
    return jax.nn.log_softmax(h3, axis=1)


if __name__ == "__main__":
    # Small shapes consistent with the module's forward (node classification).
    N, IN_DIM, HIDDEN, OUT_DIM, NUM_RULES = 300, 16, 32, 8, 3

    key = jax.random.PRNGKey(0)
    kx, kp, ke = jax.random.split(key, 3)

    x = jax.random.normal(kx, (N, IN_DIM), jnp.float32)

    # Ring graph (both directions) plus random chords.
    srcs = jnp.arange(N)
    dsts = (srcs + 1) % N
    extra_src = jax.random.randint(ke, (2 * N,), 0, N)
    extra_dst = jax.random.randint(jax.random.fold_in(ke, 1), (2 * N,), 0, N)
    edge_index = jnp.stack(
        [jnp.concatenate([srcs, dsts, extra_src]),
         jnp.concatenate([dsts, srcs, extra_dst])], axis=0).astype(jnp.int32)

    # `rules` is accepted by the module but never used; keep a placeholder.
    rules = jnp.zeros((NUM_RULES,), jnp.float32)

    a_hat = build_normalized_adjacency(edge_index, N)
    params = init_params(kp, IN_DIM, HIDDEN, OUT_DIM, NUM_RULES)

    out = jax.block_until_ready(kegnn_forward(a_hat, x, params))

    ref_bf16 = reference_forward(a_hat, x, params, emulate_bf16=True)
    ref_f32 = reference_forward(a_hat, x, params)

    assert out.shape == (N, OUT_DIM)
    # Tight check vs. a reference that mirrors the kernel's bf16 MXU inputs,
    # loose sanity check vs. the pure-f32 reference (bf16 rounding).
    assert jnp.allclose(out, ref_bf16, atol=2e-2, rtol=2e-2)
    assert jnp.allclose(out, ref_f32, atol=2e-1, rtol=2e-1)

    print("KERNEL_OK")
</pallas_src>

<mosaic_0001>
module attributes {stable_mosaic.version = 11 : i64} {
  func.func @_feature_transform_kernel(%arg0: i32, %arg1: memref<128x128xbf16, #tpu.memory_space<vmem>>, %arg2: memref<128x128xbf16, #tpu.memory_space<vmem>>, %arg3: memref<128x128xbf16, #tpu.memory_space<vmem>>) attributes {dimension_semantics = [#tpu.dimension_semantics<parallel>], iteration_bounds = array<i64: 3>, scalar_prefetch = 0 : i64, scratch_operands = 0 : i64, tpu.core_type = #tpu.core_type<tc>, window_params = [{transform_indices = @transform_0, window_bounds = array<i64: 128, 128>}, {pipeline_mode = #tpu.pipeline_mode<synchronous>, transform_indices = @transform_1, window_bounds = array<i64: 128, 128>}, {transform_indices = @transform_2, window_bounds = array<i64: 128, 128>}]} {
    %c0 = arith.constant 0 : index
    %c0_0 = arith.constant 0 : index
    %0 = vector.load %arg1[%c0, %c0_0] : memref<128x128xbf16, #tpu.memory_space<vmem>>, vector<128x128xbf16>
    %c0_1 = arith.constant 0 : index
    %c0_2 = arith.constant 0 : index
    %1 = vector.load %arg2[%c0_1, %c0_2] : memref<128x128xbf16, #tpu.memory_space<vmem>>, vector<128x128xbf16>
    %cst = arith.constant dense<0.000000e+00> : vector<128x128xf32>
    %2 = tpu.matmul %0, %1, %cst {dimension_numbers = #tpu.dot_dimension_numbers<[1], [0], [0], [1], [0, 0, 1, 1], [], []>} : vector<128x128xbf16>, vector<128x128xbf16>, vector<128x128xf32> -> vector<128x128xf32>
    %3 = arith.truncf %2 : vector<128x128xf32> to vector<128x128xbf16>
    %c0_3 = arith.constant 0 : index
    %c0_4 = arith.constant 0 : index
    %4 = vector.load %arg3[%c0_3, %c0_4] : memref<128x128xbf16, #tpu.memory_space<vmem>>, vector<128x128xbf16>
    tpu.vector_store %arg3[%c0_3, %c0_4], %3 {strides = array<i32>} : memref<128x128xbf16, #tpu.memory_space<vmem>>, vector<128x128xbf16>,
    return
  }
  func.func @transform_0(%arg0: i32) -> (i32, i32) {
    %c0_i32 = arith.constant 0 : i32
    %c0_i32_0 = arith.constant 0 : i32
    return %arg0, %c0_i32 : i32, i32
  }
  func.func @transform_1(%arg0: i32) -> (i32, i32) {
    %c0_i32 = arith.constant 0 : i32
    %c0_i32_0 = arith.constant 0 : i32
    %c0_i32_1 = arith.constant 0 : i32
    return %c0_i32, %c0_i32_0 : i32, i32
  }
  func.func @transform_2(%arg0: i32) -> (i32, i32) {
    %c0_i32 = arith.constant 0 : i32
    %c0_i32_0 = arith.constant 0 : i32
    return %arg0, %c0_i32 : i32, i32
  }
}

</mosaic_0001>

<bundles_post_ra>
// kernel: tpu_custom_call.1
= control target key start
LH: loop header
LB: loop body
LE: loop exit
PB: predicated region body
PF: predicated region fallthrough
CT: control target
= control target key end

     0   :  { %7 = vsyncpa [#allocation3], 0  ;;  %s1200_s0 = inlined_call_operand.hbm [shape: bf16[384,128], index: 0, kind: input, shape index: {}]   ;;  %s1201_s1 = inlined_call_operand.hbm [shape: bf16[128,128], index: 1, kind: input, shape index: {}]   ;;  %s1202_s2 = inlined_call_operand.hbm [shape: bf16[384,128], index: 2, kind: output, shape index: {}]  }
   0x1   :  { %9 = vsyncpa [#allocation3 + $0x1], 0 }
   0x2   :  { %10 = vsyncpa [#allocation6], 0 }
   0x3   :  { %11 = vsyncpa [#allocation4], 0 }
   0x4   :  { %13 = vsyncpa [#allocation4 + $0x1], 0  ;;  %s988_s9 = smov 0   ;;  %s990_s10 = smov 0  }
   0x5   :  { %s992_s11 = smov 0   ;;  %s994_s12 = smov 0  }
   0x6 LB: > { %s1009_s13 = sadd.s32 4294967295, %s964_s12   ;;  %s582_s14 = sadd.s32 4294967294, %s964_s12   ;;  %s964_s12 = sphi %s994_s12, %s1221_s12   ;;  %s960_s11 = sphi %s992_s11, %s1220_s11   ;;  %s956_s10 = sphi %s990_s10, %s1219_s10   ;;  %s952_s9 = sphi %s988_s9, %s1218_s9  }
   0x7   : > { %p39_p0 = scmp.ne.s32.totalorder %s956_s10, %s952_s9  ;;  %p1203_p1 = scmp.eq.s32.totalorder %s1009_s13, 0 }
   0x8   : > { %p90_p3 = scmp.eq.s32.totalorder %s582_s14, 2  ;;  %p583_p5 = scmp.ge.s32.totalorder %s964_s12, 1 }
   0x9   : > { %p1018_p4 = por %p1203_p1, %p39_p0  ;;  %p97_p7 = scmp.lt.s32.totalorder %s964_s12, 4 }
   0xa   : > { %p1023_p6 = por %p90_p3, %p39_p0  ;;  %s966_s18 = smov [#allocation5]  }
   0xb   : > { %s1206_s15 = scalar_select %p1018_p4, 1, 0 }
   0xc   : > { %s1207_s16 = scalar_select %p1023_p6, 1, 0 }
   0xd   : > { %p1028_p8 = pnand %p583_p5, %p97_p7  ;;  %s109_s19 = sshll.u32 %s966_s18, 4  ;;  %s110_s19 = int_to_ptr.vmem [resolvable:$true] %s109_s19 }
   0xe   : > { %s1041_s21 = sadd.s32 1, %s964_s12   ;;  %s26_s22 = sadd.s32 1, %s960_s11 }
   0xf   : > { %s1208_s17 = scalar_select %p1028_p8, 1, 0 }
  0x10   : > { %p767_p9 = pneg %p1028_p8  ;;  %s23_s23 = ssub.s32 %s964_s12, %s1041_s21 }
  0x11   : > { %s836_s26 = scalar_lea.hbm %s1201_s1, 1024 }
  0x12   : > { %p1036_p10 = pnand %p767_p9, %p1203_p1  ;;  %p837_p11 = scmp.ne.s32.totalorder %s1201_s1, %s836_s26 }
  0x13   : > { %p843_p3 = scmp.lt.u32.totalorder %s836_s26, %s1201_s1 }
  0x14   : > { %p838_p12 = pneg %p1036_p10 }
  0x16   : > { %p839_p13 = pnand %p838_p12, %p837_p11 }
  0x18   : > { %p840_p0 = pneg %p839_p13 }
  0x1a   : > { %p845_p5 = pnand %p843_p3, %p840_p0 }
  0x1c   : > { %848 = shalt.err (!%p845_p5)
}
  0x1d   : > { %s849_s3 = scalar_lea.vmem %s110_s19, 1024  ;;  %p857_p2 = scmp.lt.s32.totalorder %s110_s19, %s110_s19 }
  0x1e   : > { %p850_p7 = scmp.ne.s32.totalorder %s110_s19, %s849_s3  ;;  %p858_p6 = scmp.lt.s32.totalorder %s849_s3, %s849_s3 }
  0x20   : > { %p852_p9 = pnand %p850_p7, %p838_p12  ;;  %p859_p4 = por %p858_p6, %p857_p2 }
  0x22   : > { %p853_p1 = pneg %p852_p9 }
  0x24   : > { %p860_p8 = pnand %p859_p4, %p853_p1 }
  0x26   : > { %863 = shalt.err (!%p860_p8)
}
  0x27   : > { %s967_s4 = smov 64   ;;  %s968_s5 = smov 4  }
  0x28   : > { %770 = dma.hbm_to_vmem [thread:$0]  (!%p1036_p10), %s1201_s1, 1024, %s110_s19, [#allocation6], %s967_s4, %s967_s4, %s968_s5  }
  0x29   : > { %p24_p1 = scmp.eq.s32.totalorder %s23_s23, 0  ;;  %p33_p2 = scmp.ne.s32.totalorder %s960_s11, %s956_s10 }
  0x2a   : > { %p34_p4 = scmp.eq.s32.totalorder %s964_s12, 0  ;;  %p780_p6 = scmp.lt.s32.totalorder %s964_s12, 3 }
  0x2b   : > { %s1070_s8 = scalar_select %p24_p1, %s960_s11, %s26_s22  }
  0x2c   : > { %p35_p8 = por %p34_p4, %p33_p2  ;;  %p1210_p11 = scmp.eq.s32.totalorder %s1009_s13, 2 }
  0x2d   : > { %s123_s18 = sand.u32 1, %s960_s11   ;;  %s630_s20 = sshll.u32 %s964_s12, 10 }
  0x2e   : > { %p1074_p12 = por %p1210_p11, %p33_p2  ;;  %s586_s24 = sshll.u32 %s123_s18, 6 }
  0x2f   : > { %s1083_s27 = scalar_lea.hbm %s1200_s0, %s630_s20  ;;  %s127_s19 = scalar_lea.vmem [#allocation2], %s586_s24 }
  0x30   : > { %s134_s22 = sshll.u32 %s127_s19, 4  ;;  %p1085_p10 = pnand %p780_p6, %p35_p8  ;;  %s1089_s22 = int_to_ptr.vmem [resolvable:$true] %s134_s22 }
  0x31   : > { %s1091_s28 = scalar_lea.sflag [#allocation3], %s123_s18  ;;  %s864_s29 = scalar_lea.hbm %s1083_s27, 1024 }
  0x32   : > { %p865_p13 = scmp.ne.s32.totalorder %s1083_s27, %s864_s29  ;;  %p866_p0 = pneg %p1085_p10 }
  0x33   : > { %s869_s6 = scalar_lea.hbm %s1200_s0, 3072  ;;  %p870_p7 = scmp.lt.u32.totalorder %s1083_s27, %s1200_s0 }
  0x34   : > { %p867_p3 = pnand %p866_p0, %p865_p13  ;;  %p871_p9 = scmp.lt.u32.totalorder %s869_s6, %s864_s29 }
  0x35   : > { %p873_p2 = scmp.lt.u32.totalorder %s864_s29, %s1083_s27 }
  0x36   : > { %p868_p5 = pneg %p867_p3  ;;  %p872_p1 = por %p871_p9, %p870_p7 }
  0x38   : > { %p874_p4 = por %p873_p2, %p872_p1 }
  0x3a   : > { %p875_p6 = pnand %p874_p4, %p868_p5 }
  0x3c   : > { %878 = shalt.err (!%p875_p6)
}
  0x3d   : > { %s879_s18 = scalar_lea.vmem %s1089_s22, 1024  ;;  %s969_s24 = smov [#allocation2]  }
  0x3e   : > { %p880_p8 = scmp.ne.s32.totalorder %s1089_s22, %s879_s18  ;;  %s884_s25 = sshll.u32 %s969_s24, 4  ;;  %s885_s25 = int_to_ptr.vmem [resolvable:$false] %s884_s25 }
  0x3f   : > { %s886_s26 = scalar_lea.vmem %s885_s25, 2048  ;;  %p887_p3 = scmp.lt.s32.totalorder %s1089_s22, %s885_s25 }
  0x40   : > { %p882_p11 = pnand %p880_p8, %p866_p0  ;;  %p888_p7 = scmp.lt.s32.totalorder %s886_s26, %s879_s18 }
  0x42   : > { %p883_p13 = pneg %p882_p11  ;;  %p889_p9 = por %p888_p7, %p887_p3 }
  0x44   : > { %p890_p1 = pnand %p889_p9, %p883_p13 }
  0x46   : > { %893 = shalt.err (!%p890_p1)
}
  0x47   : > { %774 = dma.hbm_to_vmem [thread:$0]  (!%p1085_p10), %s1083_s27, 1024, %s1089_s22, %s1091_s28, %s967_s4, %s967_s4, %s968_s5  }
  0x48   : > { %p1213_p0 = scmp.ne.s32.totalorder %s1208_s17, 0 }
  0x49   : > { %s1125_s19 = sand.u32 (!%p1213_p0), 1, %s956_s10   ;;  %p1214_p5 = scmp.ne.s32.totalorder (!%p1213_p0), %s1206_s15, 0 }
  0x4a   : > { %146 = sbr.rel (%p1213_p0) target bundleno = 358 (0x166), region = 28  ;;  %s590_s29 = sshll.u32 (!%p1213_p0), %s1125_s19, 6 }
  0x4b   : > { %s149_s30 = scalar_lea.sflag (!%p1213_p0), [#allocation3], %s1125_s19  ;;  %s1131_s23 = scalar_lea.vmem (!%p1213_p0), [#allocation2], %s590_s29 }
  0x51   : > { %939 = dma.done.wait (%p1214_p5), %s149_s30, 1024  }
  0x52   : > { %941 = vsyncadd (%p1214_p5), %s149_s30, 4294966272  ;;  %p1215_p10 = scmp.eq.s32.totalorder %s1009_s13, 0 }
  0x54   : > { %943 = dma.done.wait (%p1215_p10), [#allocation6], 1024   ;;  %p1216_p2 = pmov %p1215_p10 }
  0x55   : > { %v820_v0 = vld [vmem:[#allocation5] sm:$0xff]   ;;  %v821_v1 = vld [vmem:[#allocation5 + $0x8] sm:$0xff]   ;;  %v822_v2 = vld [vmem:[#allocation5 + $0x10] sm:$0xff]   ;;  %s176_s15 = scalar_lea.vmem [#allocation7], %s590_s29  ;;  %s647_s4 = sshll.u32 %s1009_s13, 10 }
  0x56   : > { %945 = vsyncadd (%p1216_p2), [#allocation6], 4294966272  ;;  %711 = vmatprep.subr.bf16.mxu0 %v820_v0  ;;  %743 = vmatprep.subr.bf16.mxu1 %v820_v0  ;;  %v823_v3 = vld [vmem:[#allocation5 + $0x18] sm:$0xff]   ;;  %v828_v4 = vld [vmem:[%s1131_s23] sm:$0xff]   ;;  %s499_s17 = sshll.u32 %s176_s15, 4  ;;  %s1157_s22 = scalar_lea.hbm %s1202_s2, %s647_s4  ;;  %s1152_s17 = int_to_ptr.vmem [resolvable:$true] %s499_s17 }
  0x57   : > { %712 = vmatpush3.bf16.msra.mxu0 %v820_v0  ;;  %751 = vmatpush3.bf16.msra.mxu1 %v820_v0  ;;  %v829_v5 = vld [vmem:[%s1131_s23 + $0x20] sm:$0xff]   ;;  %v825_v7 = vld [vmem:[#allocation5 + $0x28] sm:$0xff]   ;;  %v826_v8 = vld [vmem:[#allocation5 + $0x30] sm:$0xff]   ;;  %s486_s13 = scalar_lea.sflag [#allocation4], %s1125_s19  ;;  %s894_s28 = scalar_lea.vmem %s1152_s17, 1024 }
  0x58   : > { %713 = vmatprep.subr.bf16.mxu0 %v821_v1  ;;  %744 = vmatprep.subr.bf16.mxu1 %v821_v1  ;;  %v824_v6 = vld [vmem:[#allocation5 + $0x20] sm:$0xff]   ;;  %v827_v9 = vld [vmem:[#allocation5 + $0x38] sm:$0xff]   ;;  %v830_v10 = vld [vmem:[%s1131_s23 + $0x8] sm:$0xff]   ;;  %p895_p4 = scmp.ne.s32.totalorder %s1152_s17, %s894_s28  ;;  %s970_s3 = smov [#allocation7]  }
  0x59   : > { %727 = vmatprep.mubr.bf16.mxu0 %v828_v4  ;;  %735 = vmatprep.mubr.bf16.mxu1 %v829_v5  ;;  %v831_v11 = vld [vmem:[%s1131_s23 + $0x28] sm:$0xff]   ;;  %v832_v12 = vld [vmem:[%s1131_s23 + $0x10] sm:$0xff]   ;;  %v834_v14 = vld [vmem:[%s1131_s23 + $0x18] sm:$0xff]   ;;  %s898_s6 = sshll.u32 %s970_s3, 4  ;;  %s899_s6 = int_to_ptr.vmem [resolvable:$false] %s898_s6 }
  0x5a   : > { %v833_v13 = vld [vmem:[%s1131_s23 + $0x30] sm:$0xff]   ;;  %v835_v15 = vld [vmem:[%s1131_s23 + $0x38] sm:$0xff]   ;;  %p896_p6 = pnand %p895_p4, %p1074_p12  ;;  %s900_s7 = scalar_lea.vmem %s899_s6, 2048 }
  0x5b   : > { %714 = vmatpush3.bf16.msra.mxu0 %v821_v1  ;;  %752 = vmatpush3.bf16.msra.mxu1 %v821_v1  ;;  %p901_p11 = scmp.lt.s32.totalorder %s1152_s17, %s899_s6  ;;  %p902_p13 = scmp.lt.s32.totalorder %s900_s7, %s894_s28 }
  0x5c   : > { %715 = vmatprep.subr.bf16.mxu0 %v822_v2  ;;  %745 = vmatprep.subr.bf16.mxu1 %v822_v2  ;;  %p897_p8 = pneg %p896_p6 }
  0x5d   : > { %p903_p3 = por %p902_p13, %p901_p11 }
  0x5f   : > { %716 = vmatpush3.bf16.msra.mxu0 %v822_v2  ;;  %753 = vmatpush3.bf16.msra.mxu1 %v822_v2  ;;  %p904_p7 = pnand %p903_p3, %p897_p8 }
  0x60   : > { %717 = vmatprep.subr.bf16.mxu0 %v823_v3  ;;  %746 = vmatprep.subr.bf16.mxu1 %v823_v3 }
  0x63   : > { %718 = vmatpush3.bf16.msra.mxu0 %v823_v3  ;;  %754 = vmatpush3.bf16.msra.mxu1 %v823_v3 }
  0x64   : > { %719 = vmatprep.subr.bf16.mxu0 %v824_v6  ;;  %747 = vmatprep.subr.bf16.mxu1 %v824_v6 }
  0x67   : > { %720 = vmatpush3.bf16.msra.mxu0 %v824_v6  ;;  %755 = vmatpush3.bf16.msra.mxu1 %v824_v6 }
  0x68   : > { %721 = vmatprep.subr.bf16.mxu0 %v825_v7  ;;  %748 = vmatprep.subr.bf16.mxu1 %v825_v7 }
  0x6b   : > { %722 = vmatpush3.bf16.msra.mxu0 %v825_v7  ;;  %756 = vmatpush3.bf16.msra.mxu1 %v825_v7 }
  0x6c   : > { %723 = vmatprep.subr.bf16.mxu0 %v826_v8  ;;  %749 = vmatprep.subr.bf16.mxu1 %v826_v8 }
  0x6f   : > { %724 = vmatpush3.bf16.msra.mxu0 %v826_v8  ;;  %757 = vmatpush3.bf16.msra.mxu1 %v826_v8 }
  0x70   : > { %725 = vmatprep.subr.bf16.mxu0 %v827_v9  ;;  %750 = vmatprep.subr.bf16.mxu1 %v827_v9 }
  0x73   : > { %726 = vmatpush3.bf16.msra.mxu0 %v827_v9  ;;  %758 = vmatpush3.bf16.msra.mxu1 %v827_v9 }
  0x76   : > { %728 = vmatmul.mubr.bf16.vlgmr.msra.gmra.mrb[0].mxu0 %v830_v10  ;;  %736 = vmatmul.mubr.bf16.vlgmr.msra.gmra.mrb[0].mxu1 %v831_v11 }
  0x77   : > { %731 = vmatprep.mubr.bf16.mxu0 %v832_v12  ;;  %739 = vmatprep.mubr.bf16.mxu1 %v833_v13 }
  0x7e   : > { %732 = vmatmul.mubr.bf16.gmra.mrb[4].mxu0 %v834_v14  ;;  %740 = vmatmul.mubr.bf16.gmra.mrb[4].mxu1 %v835_v15 }
 0x149   : > { %v729_v16 = vpop.f32.mrb[0].mxu0  ;;  %v737_v17 = vpop.f32.mrb[0].mxu1 }
 0x14a   : > { %v342_v18 = vpop.f32.mrb[1].mxu0  ;;  %v374_v19 = vpop.f32.mrb[1].mxu1 }
 0x14b   : > { %v730_v20 = vpop.f32.mrb[2].mxu0  ;;  %v738_v21 = vpop.f32.mrb[2].mxu1 }
 0x14c   : > { %v656_v22 = vpack.c.bf16 %v730_v20, %v729_v16  ;;  %v676_v23 = vpack.c.bf16 %v738_v21, %v737_v17  ;;  %v345_v24 = vpop.f32.mrb[3].mxu0  ;;  %v377_v25 = vpop.f32.mrb[3].mxu1 }
 0x14d   : > { %v651_v26 = vpack.c.bf16 %v345_v24, %v342_v18  ;;  %v671_v27 = vpack.c.bf16 %v377_v25, %v374_v19 }
 0x14e   : > { %688 = vst [vmem:[%s176_s15 + $0x8] sm:$0xff] %v656_v22   ;;  %692 = vst [vmem:[%s176_s15 + $0x28] sm:$0xff] %v676_v23  }
 0x14f   : > { %652 = vst [vmem:[%s176_s15] sm:$0xff] %v651_v26   ;;  %691 = vst [vmem:[%s176_s15 + $0x20] sm:$0xff] %v671_v27  }
 0x151   : > { %v733_v28 = vpop.f32.mrb[4].mxu0  ;;  %v741_v29 = vpop.f32.mrb[4].mxu1 }
 0x152   : > { %v358_v30 = vpop.f32.mrb[5].mxu0  ;;  %v390_v31 = vpop.f32.mrb[5].mxu1 }
 0x153   : > { %v734_v32 = vpop.f32.mrb[6].mxu0  ;;  %v742_v33 = vpop.f32.mrb[6].mxu1 }
 0x154   : > { %v666_v34 = vpack.c.bf16 %v734_v32, %v733_v28  ;;  %v686_v35 = vpack.c.bf16 %v742_v33, %v741_v29  ;;  %v361_v36 = vpop.f32.mrb[7].mxu0  ;;  %v393_v37 = vpop.f32.mrb[7].mxu1 }
 0x155   : > { %v661_v38 = vpack.c.bf16 %v361_v36, %v358_v30  ;;  %v681_v39 = vpack.c.bf16 %v393_v37, %v390_v31 }
 0x156   : > { %690 = vst [vmem:[%s176_s15 + $0x18] sm:$0xff] %v666_v34   ;;  %694 = vst [vmem:[%s176_s15 + $0x38] sm:$0xff] %v686_v35  }
 0x157   : > { %689 = vst [vmem:[%s176_s15 + $0x10] sm:$0xff] %v661_v38   ;;  %693 = vst [vmem:[%s176_s15 + $0x30] sm:$0xff] %v681_v39  }
 0x158   : > { %907 = shalt.err (!%p904_p7)
}
 0x159   : > { %s908_s20 = scalar_lea.hbm %s1157_s22, 1024  ;;  %s912_s25 = scalar_lea.hbm %s1202_s2, 3072 }
 0x15a   : > { %p909_p9 = scmp.ne.s32.totalorder %s1157_s22, %s908_s20  ;;  %p913_p5 = scmp.lt.u32.totalorder %s1157_s22, %s1202_s2 }
 0x15b   : > { %p914_p10 = scmp.lt.u32.totalorder %s912_s25, %s908_s20  ;;  %p916_p4 = scmp.lt.u32.totalorder %s908_s20, %s1157_s22 }
 0x15c   : > { %p910_p1 = pnand %p909_p9, %p1074_p12 }
 0x15d   : > { %p915_p2 = por %p914_p10, %p913_p5 }
 0x15e   : > { %p911_p0 = pneg %p910_p1 }
 0x15f   : > { %p917_p6 = por %p916_p4, %p915_p2 }
 0x161   : > { %p918_p8 = pnand %p917_p6, %p911_p0 }
 0x163   : > { %921 = shalt.err (!%p918_p8)
}
 0x164   : > { %s971_s30 = smov 64   ;;  %s972_s23 = smov 4  }
 0x165   : > { %765 = dma.vmem_to_hbm [thread:$0]  (%p1074_p12), %s1152_s17, 1024, %s1157_s22, %s486_s13, %s971_s30, %s971_s30, %s972_s23  }
 0x166 PF: > { %p782_p11 = scmp.ge.s32.totalorder %s964_s12, 2  ;;  %s514_s15 = sand.u32 1, %s952_s9  }
 0x167   : > { %p1217_p13 = scmp.ne.s32.totalorder %s1207_s16, 0  ;;  %s515_s4 = scalar_lea.sflag [#allocation4], %s514_s15 }
 0x169   : > { %p776_p3 = pnand %p782_p11, %p1217_p13 }
 0x16b   : > { %947 = dma.done.wait (!%p776_p3), %s515_s4, 1024  }
 0x16c   : > { %949 = vsyncadd (!%p776_p3), %s515_s4, 4294966272  ;;  %p16_p7 = scmp.ge.s32.totalorder %s1041_s21, 5   ;;  %s1218_s9 = smov %s956_s10 }
 0x16d   : > { %s1219_s10 = smov %s960_s11  ;;  %s1220_s11 = smov %s1070_s8 }
 0x16e   : > { %s1221_s12 = smov %s1041_s21  ;;  %18 = sbr.rel (!%p16_p7) target bundleno = 6 (0x6), region = 77 }
 0x175   :  { %520 = vsyncpa [#allocation3], 1 }
 0x176   :  { %522 = vsyncpa [#allocation3 + $0x1], 1 }
 0x177   :  { %523 = vsyncpa [#allocation6], 1 }
 0x178   :  { %524 = vsyncpa [#allocation4], 1 }
 0x179   :  { %526 = vsyncpa [#allocation4 + $0x1], 1 }

</bundles_post_ra>
